<compile_context>
chip_gen: v5e
topology: v5e:2x2
jax: 0.10.0
libtpu: 0.0.40
codegen_flags: <defaults>
</compile_context>

<pallas_src>
import functools
import math

import jax
import jax.numpy as jnp
import numpy as np
from jax.experimental import pallas as pl
from jax.experimental.pallas import tpu as pltpu


def _round_up(x, m):
    return ((x + m - 1) // m) * m


# ----------------------------------------------------------------------------
# Pallas kernel: one (batch, q-tile) grid step of fused cross-attention
# ----------------------------------------------------------------------------
def cross_attention_kernel(tq_ref, sp_ref, wq_ref, bq_ref, wkv_ref, bkv_ref,
                           wo_ref, bo_ref, o_ref, *, nhead, hdp, s_valid):
    """
    tq_ref : (L_tile, Ep) bf16  query tile (batch dim squeezed by BlockSpec)
    sp_ref : (Sp, Ep)     bf16  key/value sequence for this batch element
    wq_ref : (Ep, Ep)     bf16  padded Q projection (1/sqrt(hd) pre-folded)
    bq_ref : (1, Ep)      f32
    wkv_ref: (Ep, 2*Ep)   bf16  padded fused [K | V] projection
    bkv_ref: (1, 2*Ep)    f32
    wo_ref : (Ep, Ep)     bf16  padded out-projection (right-multiply form)
    bo_ref : (1, Ep)      f32
    o_ref  : (L_tile, Ep) f32   output tile (batch-major, padded, lane-dense)
    """
    x = tq_ref[...]                       # (Lt, Ep)
    kv = sp_ref[...]                      # (Sp, Ep)
    ep = x.shape[-1]
    sp_len = kv.shape[0]

    # Lane-dense fused projections on the MXU, f32 accumulation.
    q = jnp.dot(x, wq_ref[...], preferred_element_type=jnp.float32) + bq_ref[...]
    kvp = (jnp.dot(kv, wkv_ref[...], preferred_element_type=jnp.float32)
           + bkv_ref[...])
    k = kvp[:, :ep]
    v = kvp[:, ep:]

    q = q.astype(jnp.bfloat16)
    k = k.astype(jnp.bfloat16)
    v = v.astype(jnp.bfloat16)

    # Mask padded key positions (only traced if the source length was padded).
    need_mask = (sp_len != s_valid)
    if need_mask:
        kv_mask = (jax.lax.broadcasted_iota(jnp.int32, (x.shape[0], sp_len), 1)
                   < s_valid)

    # Per-head attention. Heads live in hdp-wide, lane-aligned column blocks;
    # padded per-head lanes of Q/K/V are exactly zero, so scores are exact.
    o_parts = []
    for h in range(nhead):                # static unroll; nhead is small
        lo = h * hdp
        q_h = q[:, lo:lo + hdp]           # (Lt, hdp)
        k_h = k[:, lo:lo + hdp]           # (Sp, hdp)
        v_h = v[:, lo:lo + hdp]           # (Sp, hdp)
        s = jax.lax.dot_general(q_h, k_h, (((1,), (1,)), ((), ())),
                                preferred_element_type=jnp.float32)  # (Lt, Sp)
        if need_mask:
            s = jnp.where(kv_mask, s, -jnp.inf)
        s = s - jnp.max(s, axis=-1, keepdims=True)
        p = jnp.exp(s)
        p = p * pl.reciprocal(jnp.sum(p, axis=-1, keepdims=True), approx=True)
        o_parts.append(jnp.dot(p.astype(jnp.bfloat16), v_h,
                               preferred_element_type=jnp.float32))  # (Lt, hdp)

    # Assemble all heads into one full-width buffer, then a single lane-dense
    # output projection.
    o_full = jnp.concatenate(o_parts, axis=-1).astype(jnp.bfloat16)  # (Lt, Ep)
    out = (jnp.dot(o_full, wo_ref[...], preferred_element_type=jnp.float32)
           + bo_ref[...])
    o_ref[...] = out.astype(o_ref.dtype)


# ----------------------------------------------------------------------------
# One-time parameter preparation (hoisted out of the per-call wrapper)
# ----------------------------------------------------------------------------
def prepare_params(params, d_model, nhead):
    E = d_model
    hd = E // nhead
    Ep = _round_up(E, 128)
    assert Ep % nhead == 0, "nhead must divide the padded model dim"
    hdp = Ep // nhead
    scale = 1.0 / math.sqrt(hd)

    w_in = jnp.asarray(params["in_proj_weight"], jnp.float32)   # (3E, E)
    b_in = jnp.asarray(params["in_proj_bias"], jnp.float32)     # (3E,)

    def pad_proj(w, b, s):
        # torch weight (E_out, E_in), applied as x @ w.T ; re-lay per head so
        # head h occupies columns [h*hdp, h*hdp+hd) and padded lanes are zero.
        wt = (w.T * s).reshape(E, nhead, hd)
        wt = jnp.pad(wt, ((0, Ep - E), (0, 0), (0, hdp - hd))).reshape(Ep, Ep)
        bb = (b * s).reshape(nhead, hd)
        bb = jnp.pad(bb, ((0, 0), (0, hdp - hd))).reshape(1, Ep)
        return wt, bb

    wq, bq = pad_proj(w_in[:E], b_in[:E], scale)        # scale folded into Q
    wk, bk = pad_proj(w_in[E:2 * E], b_in[E:2 * E], 1.0)
    wv, bv = pad_proj(w_in[2 * E:], b_in[2 * E:], 1.0)
    wkv = jnp.concatenate([wk, wv], axis=1)             # (Ep, 2Ep)
    bkv = jnp.concatenate([bk, bv], axis=1)             # (1, 2Ep)

    wo_t = jnp.asarray(params["out_proj_weight"], jnp.float32).T  # (E, E)
    wo_t = wo_t.reshape(nhead, hd, E)
    wo = jnp.pad(wo_t, ((0, 0), (0, hdp - hd), (0, Ep - E))).reshape(Ep, Ep)
    bo = jnp.pad(jnp.asarray(params["out_proj_bias"], jnp.float32),
                 (0, Ep - E)).reshape(1, Ep)

    return {
        "wq": wq.astype(jnp.bfloat16), "bq": bq,
        "wkv": wkv.astype(jnp.bfloat16), "bkv": bkv,
        "wo": wo.astype(jnp.bfloat16), "bo": bo,
    }


# ----------------------------------------------------------------------------
# Forward wrapper
# ----------------------------------------------------------------------------
@functools.partial(jax.jit, static_argnames=("nhead",))
def cross_attention_forward(temporal, spatial, prepared, nhead):
    """temporal: (L, N, E) query; spatial: (S, N, E) key/value -> (L, N, E)."""
    L, N, E = temporal.shape
    S = spatial.shape[0]
    Ep = prepared["wq"].shape[0]
    hdp = Ep // nhead

    Lp = _round_up(L, 8)
    L_tile = min(128, Lp)
    Lp = _round_up(Lp, L_tile)
    Sp = _round_up(S, 8)

    # Batch-major, zero-padded, bf16 activations: each grid step DMAs one
    # contiguous (L_tile, Ep)/(Sp, Ep) slab (no middle-axis strided gathers).
    tq = jnp.pad(jnp.transpose(temporal, (1, 0, 2)),
                 ((0, 0), (0, Lp - L), (0, Ep - E))).astype(jnp.bfloat16)
    sp = jnp.pad(jnp.transpose(spatial, (1, 0, 2)),
                 ((0, 0), (0, Sp - S), (0, Ep - E))).astype(jnp.bfloat16)

    kernel = functools.partial(cross_attention_kernel,
                               nhead=nhead, hdp=hdp, s_valid=S)

    out = pl.pallas_call(
        kernel,
        out_shape=jax.ShapeDtypeStruct((N, Lp, Ep), jnp.float32),
        grid_spec=pltpu.PrefetchScalarGridSpec(
            num_scalar_prefetch=0,
            grid=(N, Lp // L_tile),
            in_specs=[
                pl.BlockSpec((None, L_tile, Ep), lambda b, qi: (b, qi, 0)),
                pl.BlockSpec((None, Sp, Ep), lambda b, qi: (b, 0, 0)),
                pl.BlockSpec((Ep, Ep), lambda b, qi: (0, 0)),
                pl.BlockSpec((1, Ep), lambda b, qi: (0, 0)),
                pl.BlockSpec((Ep, 2 * Ep), lambda b, qi: (0, 0)),
                pl.BlockSpec((1, 2 * Ep), lambda b, qi: (0, 0)),
                pl.BlockSpec((Ep, Ep), lambda b, qi: (0, 0)),
                pl.BlockSpec((1, Ep), lambda b, qi: (0, 0)),
            ],
            out_specs=pl.BlockSpec((None, L_tile, Ep),
                                   lambda b, qi: (b, qi, 0)),
        ),
        compiler_params=pltpu.CompilerParams(
            dimension_semantics=("parallel", "parallel")),
    )(tq, sp, prepared["wq"], prepared["bq"], prepared["wkv"],
      prepared["bkv"], prepared["wo"], prepared["bo"])

    # Slice padding off and return the PyTorch (L, N, E) layout.
    return jnp.transpose(out[:, :L, :E], (1, 0, 2))


# ----------------------------------------------------------------------------
# Deterministic parameter init (mirrors nn.MultiheadAttention shapes)
# ----------------------------------------------------------------------------
def init_params(key, d_model):
    k1, k2, k3, k4 = jax.random.split(key, 4)
    xav = math.sqrt(6.0 / (4.0 * d_model))
    bound = 1.0 / math.sqrt(d_model)
    return {
        "in_proj_weight": jax.random.uniform(
            k1, (3 * d_model, d_model), jnp.float32, -xav, xav),
        # PyTorch zero-inits these biases; random values exercise the bias path.
        "in_proj_bias": jax.random.uniform(
            k2, (3 * d_model,), jnp.float32, -bound, bound),
        "out_proj_weight": jax.random.uniform(
            k3, (d_model, d_model), jnp.float32, -bound, bound),
        "out_proj_bias": jax.random.uniform(
            k4, (d_model,), jnp.float32, -bound, bound),
    }


# ----------------------------------------------------------------------------
# Pure-JAX f32 reference (PyTorch MultiheadAttention semantics)
# ----------------------------------------------------------------------------
def cross_attention_reference(temporal, spatial, params, nhead):
    L, N, E = temporal.shape
    S = spatial.shape[0]
    hd = E // nhead
    w_in = params["in_proj_weight"]
    b_in = params["in_proj_bias"]
    q = temporal @ w_in[:E].T + b_in[:E]
    k = spatial @ w_in[E:2 * E].T + b_in[E:2 * E]
    v = spatial @ w_in[2 * E:].T + b_in[2 * E:]
    q = q.reshape(L, N * nhead, hd).transpose(1, 0, 2) * (1.0 / math.sqrt(hd))
    k = k.reshape(S, N * nhead, hd).transpose(1, 0, 2)
    v = v.reshape(S, N * nhead, hd).transpose(1, 0, 2)
    s = jnp.einsum("bld,bsd->bls", q, k)
    p = jax.nn.softmax(s, axis=-1)
    o = jnp.einsum("bls,bsd->bld", p, v)
    o = o.transpose(1, 0, 2).reshape(L, N, E)
    return o @ params["out_proj_weight"].T + params["out_proj_bias"]


# ----------------------------------------------------------------------------
if __name__ == "__main__":
    d_model, nhead = 32, 4
    tgt_len, src_len, batch = 8, 16, 2   # temporal length, spatial length, N

    key = jax.random.PRNGKey(0)
    key, pkey, tkey, skey = jax.random.split(key, 4)
    params = init_params(pkey, d_model)
    temporal = jax.random.normal(tkey, (tgt_len, batch, d_model), jnp.float32)
    spatial = jax.random.normal(skey, (src_len, batch, d_model), jnp.float32)

    prepared = prepare_params(params, d_model, nhead)   # one-time prep
    out = cross_attention_forward(temporal, spatial, prepared, nhead=nhead)
    out = jax.block_until_ready(out)

    ref = cross_attention_reference(temporal, spatial, params, nhead)
    # bf16 matmul operands (f32 accumulation) vs. an all-f32 reference.
    np.testing.assert_allclose(np.asarray(out), np.asarray(ref),
                               rtol=3e-2, atol=3e-2)
    assert out.shape == (tgt_len, batch, d_model)

    print("KERNEL_OK")
</pallas_src>

<mosaic_0001>
module attributes {stable_mosaic.version = 11 : i64} {
  func.func @cross_attention_kernel(%arg0: i32, %arg1: i32, %arg2: memref<1x8x128xbf16, #tpu.memory_space<vmem>>, %arg3: memref<1x16x128xbf16, #tpu.memory_space<vmem>>, %arg4: memref<128x128xbf16, #tpu.memory_space<vmem>>, %arg5: memref<1x128xf32, #tpu.memory_space<vmem>>, %arg6: memref<128x256xbf16, #tpu.memory_space<vmem>>, %arg7: memref<1x256xf32, #tpu.memory_space<vmem>>, %arg8: memref<128x128xbf16, #tpu.memory_space<vmem>>, %arg9: memref<1x128xf32, #tpu.memory_space<vmem>>, %arg10: memref<1x8x128xf32, #tpu.memory_space<vmem>>) attributes {dimension_semantics = [#tpu.dimension_semantics<parallel>, #tpu.dimension_semantics<parallel>], iteration_bounds = array<i64: 2, 1>, scalar_prefetch = 0 : i64, scratch_operands = 0 : i64, tpu.core_type = #tpu.core_type<tc>, window_params = [{transform_indices = @transform_0, window_bounds = array<i64: 1, 8, 128>}, {transform_indices = @transform_1, window_bounds = array<i64: 1, 16, 128>}, {pipeline_mode = #tpu.pipeline_mode<synchronous>, transform_indices = @transform_2, window_bounds = array<i64: 128, 128>}, {pipeline_mode = #tpu.pipeline_mode<synchronous>, transform_indices = @transform_3, window_bounds = array<i64: 1, 128>}, {pipeline_mode = #tpu.pipeline_mode<synchronous>, transform_indices = @transform_4, window_bounds = array<i64: 128, 256>}, {pipeline_mode = #tpu.pipeline_mode<synchronous>, transform_indices = @transform_5, window_bounds = array<i64: 1, 256>}, {pipeline_mode = #tpu.pipeline_mode<synchronous>, transform_indices = @transform_6, window_bounds = array<i64: 128, 128>}, {pipeline_mode = #tpu.pipeline_mode<synchronous>, transform_indices = @transform_7, window_bounds = array<i64: 1, 128>}, {transform_indices = @transform_8, window_bounds = array<i64: 1, 8, 128>}]} {
    %c0 = arith.constant 0 : index
    %c0_0 = arith.constant 0 : index
    %c0_1 = arith.constant 0 : index
    %0 = vector.load %arg2[%c0, %c0_0, %c0_1] : memref<1x8x128xbf16, #tpu.memory_space<vmem>>, vector<1x8x128xbf16>
    %1 = vector.shape_cast %0 : vector<1x8x128xbf16> to vector<8x128xbf16>
    %c0_2 = arith.constant 0 : index
    %c0_3 = arith.constant 0 : index
    %c0_4 = arith.constant 0 : index
    %2 = vector.load %arg3[%c0_2, %c0_3, %c0_4] : memref<1x16x128xbf16, #tpu.memory_space<vmem>>, vector<1x16x128xbf16>
    %3 = vector.shape_cast %2 : vector<1x16x128xbf16> to vector<16x128xbf16>
    %c0_5 = arith.constant 0 : index
    %c0_6 = arith.constant 0 : index
    %4 = vector.load %arg4[%c0_5, %c0_6] : memref<128x128xbf16, #tpu.memory_space<vmem>>, vector<128x128xbf16>
    %cst = arith.constant dense<0.000000e+00> : vector<8x128xf32>
    %5 = tpu.matmul %1, %4, %cst {dimension_numbers = #tpu.dot_dimension_numbers<[1], [0], [0], [1], [0, 0, 1, 1], [], []>} : vector<8x128xbf16>, vector<128x128xbf16>, vector<8x128xf32> -> vector<8x128xf32>
    %c0_7 = arith.constant 0 : index
    %c0_8 = arith.constant 0 : index
    %6 = vector.load %arg5[%c0_7, %c0_8] : memref<1x128xf32, #tpu.memory_space<vmem>>, vector<1x128xf32>
    %7 = vector.broadcast %6 : vector<1x128xf32> to vector<8x128xf32>
    %8 = arith.addf %5, %7 : vector<8x128xf32>
    %c0_9 = arith.constant 0 : index
    %c0_10 = arith.constant 0 : index
    %9 = vector.load %arg6[%c0_9, %c0_10] : memref<128x256xbf16, #tpu.memory_space<vmem>>, vector<128x256xbf16>
    %cst_11 = arith.constant dense<0.000000e+00> : vector<16x256xf32>
    %10 = tpu.matmul %3, %9, %cst_11 {dimension_numbers = #tpu.dot_dimension_numbers<[1], [0], [0], [1], [0, 0, 1, 1], [], []>} : vector<16x128xbf16>, vector<128x256xbf16>, vector<16x256xf32> -> vector<16x256xf32>
    %c0_12 = arith.constant 0 : index
    %c0_13 = arith.constant 0 : index
    %11 = vector.load %arg7[%c0_12, %c0_13] : memref<1x256xf32, #tpu.memory_space<vmem>>, vector<1x256xf32>
    %12 = vector.broadcast %11 : vector<1x256xf32> to vector<16x256xf32>
    %13 = arith.addf %10, %12 : vector<16x256xf32>
    %14 = vector.extract_strided_slice %13 {offsets = [0, 0], sizes = [16, 128], strides = [1, 1]} : vector<16x256xf32> to vector<16x128xf32>
    %15 = vector.extract_strided_slice %13 {offsets = [0, 128], sizes = [16, 128], strides = [1, 1]} : vector<16x256xf32> to vector<16x128xf32>
    %16 = arith.truncf %8 : vector<8x128xf32> to vector<8x128xbf16>
    %17 = arith.truncf %14 : vector<16x128xf32> to vector<16x128xbf16>
    %18 = arith.truncf %15 : vector<16x128xf32> to vector<16x128xbf16>
    %19 = vector.extract_strided_slice %16 {offsets = [0, 0], sizes = [8, 32], strides = [1, 1]} : vector<8x128xbf16> to vector<8x32xbf16>
    %20 = vector.extract_strided_slice %17 {offsets = [0, 0], sizes = [16, 32], strides = [1, 1]} : vector<16x128xbf16> to vector<16x32xbf16>
    %21 = vector.extract_strided_slice %18 {offsets = [0, 0], sizes = [16, 32], strides = [1, 1]} : vector<16x128xbf16> to vector<16x32xbf16>
    %cst_14 = arith.constant dense<0.000000e+00> : vector<8x16xf32>
    %22 = tpu.matmul %19, %20, %cst_14 {dimension_numbers = #tpu.dot_dimension_numbers<[1], [1], [0], [0], [0, 0, 1, 0], [], []>} : vector<8x32xbf16>, vector<16x32xbf16>, vector<8x16xf32> -> vector<8x16xf32>
    %cst_15 = arith.constant dense<0xFF800000> : vector<8xf32>
    %23 = vector.multi_reduction <maximumf>, %22, %cst_15 [1] : vector<8x16xf32> to vector<8xf32>
    %24 = vector.shape_cast %23 : vector<8xf32> to vector<8x1xf32>
    %25 = vector.broadcast %24 : vector<8x1xf32> to vector<8x16xf32>
    %26 = arith.subf %22, %25 : vector<8x16xf32>
    %27 = math.exp %26 : vector<8x16xf32>
    %cst_16 = arith.constant dense<0.000000e+00> : vector<8xf32>
    %28 = vector.multi_reduction <add>, %27, %cst_16 [1] : vector<8x16xf32> to vector<8xf32>
    %29 = vector.shape_cast %28 : vector<8xf32> to vector<8x1xf32>
    %30 = tpu.reciprocal %29 {approx = true} : vector<8x1xf32> -> vector<8x1xf32>
    %31 = vector.broadcast %30 : vector<8x1xf32> to vector<8x16xf32>
    %32 = arith.mulf %27, %31 : vector<8x16xf32>
    %33 = arith.truncf %32 : vector<8x16xf32> to vector<8x16xbf16>
    %cst_17 = arith.constant dense<0.000000e+00> : vector<8x32xf32>
    %34 = tpu.matmul %33, %21, %cst_17 {dimension_numbers = #tpu.dot_dimension_numbers<[1], [0], [0], [1], [0, 0, 1, 1], [], []>} : vector<8x16xbf16>, vector<16x32xbf16>, vector<8x32xf32> -> vector<8x32xf32>
    %35 = vector.extract_strided_slice %16 {offsets = [0, 32], sizes = [8, 32], strides = [1, 1]} : vector<8x128xbf16> to vector<8x32xbf16>
    %36 = vector.extract_strided_slice %17 {offsets = [0, 32], sizes = [16, 32], strides = [1, 1]} : vector<16x128xbf16> to vector<16x32xbf16>
    %37 = vector.extract_strided_slice %18 {offsets = [0, 32], sizes = [16, 32], strides = [1, 1]} : vector<16x128xbf16> to vector<16x32xbf16>
    %cst_18 = arith.constant dense<0.000000e+00> : vector<8x16xf32>
    %38 = tpu.matmul %35, %36, %cst_18 {dimension_numbers = #tpu.dot_dimension_numbers<[1], [1], [0], [0], [0, 0, 1, 0], [], []>} : vector<8x32xbf16>, vector<16x32xbf16>, vector<8x16xf32> -> vector<8x16xf32>
    %cst_19 = arith.constant dense<0xFF800000> : vector<8xf32>
    %39 = vector.multi_reduction <maximumf>, %38, %cst_19 [1] : vector<8x16xf32> to vector<8xf32>
    %40 = vector.shape_cast %39 : vector<8xf32> to vector<8x1xf32>
    %41 = vector.broadcast %40 : vector<8x1xf32> to vector<8x16xf32>
    %42 = arith.subf %38, %41 : vector<8x16xf32>
    %43 = math.exp %42 : vector<8x16xf32>
    %cst_20 = arith.constant dense<0.000000e+00> : vector<8xf32>
    %44 = vector.multi_reduction <add>, %43, %cst_20 [1] : vector<8x16xf32> to vector<8xf32>
    %45 = vector.shape_cast %44 : vector<8xf32> to vector<8x1xf32>
    %46 = tpu.reciprocal %45 {approx = true} : vector<8x1xf32> -> vector<8x1xf32>
    %47 = vector.broadcast %46 : vector<8x1xf32> to vector<8x16xf32>
    %48 = arith.mulf %43, %47 : vector<8x16xf32>
    %49 = arith.truncf %48 : vector<8x16xf32> to vector<8x16xbf16>
    %cst_21 = arith.constant dense<0.000000e+00> : vector<8x32xf32>
    %50 = tpu.matmul %49, %37, %cst_21 {dimension_numbers = #tpu.dot_dimension_numbers<[1], [0], [0], [1], [0, 0, 1, 1], [], []>} : vector<8x16xbf16>, vector<16x32xbf16>, vector<8x32xf32> -> vector<8x32xf32>
    %51 = vector.extract_strided_slice %16 {offsets = [0, 64], sizes = [8, 32], strides = [1, 1]} : vector<8x128xbf16> to vector<8x32xbf16>
    %52 = vector.extract_strided_slice %17 {offsets = [0, 64], sizes = [16, 32], strides = [1, 1]} : vector<16x128xbf16> to vector<16x32xbf16>
    %53 = vector.extract_strided_slice %18 {offsets = [0, 64], sizes = [16, 32], strides = [1, 1]} : vector<16x128xbf16> to vector<16x32xbf16>
    %cst_22 = arith.constant dense<0.000000e+00> : vector<8x16xf32>
    %54 = tpu.matmul %51, %52, %cst_22 {dimension_numbers = #tpu.dot_dimension_numbers<[1], [1], [0], [0], [0, 0, 1, 0], [], []>} : vector<8x32xbf16>, vector<16x32xbf16>, vector<8x16xf32> -> vector<8x16xf32>
    %cst_23 = arith.constant dense<0xFF800000> : vector<8xf32>
    %55 = vector.multi_reduction <maximumf>, %54, %cst_23 [1] : vector<8x16xf32> to vector<8xf32>
    %56 = vector.shape_cast %55 : vector<8xf32> to vector<8x1xf32>
    %57 = vector.broadcast %56 : vector<8x1xf32> to vector<8x16xf32>
    %58 = arith.subf %54, %57 : vector<8x16xf32>
    %59 = math.exp %58 : vector<8x16xf32>
    %cst_24 = arith.constant dense<0.000000e+00> : vector<8xf32>
    %60 = vector.multi_reduction <add>, %59, %cst_24 [1] : vector<8x16xf32> to vector<8xf32>
    %61 = vector.shape_cast %60 : vector<8xf32> to vector<8x1xf32>
    %62 = tpu.reciprocal %61 {approx = true} : vector<8x1xf32> -> vector<8x1xf32>
    %63 = vector.broadcast %62 : vector<8x1xf32> to vector<8x16xf32>
    %64 = arith.mulf %59, %63 : vector<8x16xf32>
    %65 = arith.truncf %64 : vector<8x16xf32> to vector<8x16xbf16>
    %cst_25 = arith.constant dense<0.000000e+00> : vector<8x32xf32>
    %66 = tpu.matmul %65, %53, %cst_25 {dimension_numbers = #tpu.dot_dimension_numbers<[1], [0], [0], [1], [0, 0, 1, 1], [], []>} : vector<8x16xbf16>, vector<16x32xbf16>, vector<8x32xf32> -> vector<8x32xf32>
    %67 = vector.extract_strided_slice %16 {offsets = [0, 96], sizes = [8, 32], strides = [1, 1]} : vector<8x128xbf16> to vector<8x32xbf16>
    %68 = vector.extract_strided_slice %17 {offsets = [0, 96], sizes = [16, 32], strides = [1, 1]} : vector<16x128xbf16> to vector<16x32xbf16>
    %69 = vector.extract_strided_slice %18 {offsets = [0, 96], sizes = [16, 32], strides = [1, 1]} : vector<16x128xbf16> to vector<16x32xbf16>
    %cst_26 = arith.constant dense<0.000000e+00> : vector<8x16xf32>
    %70 = tpu.matmul %67, %68, %cst_26 {dimension_numbers = #tpu.dot_dimension_numbers<[1], [1], [0], [0], [0, 0, 1, 0], [], []>} : vector<8x32xbf16>, vector<16x32xbf16>, vector<8x16xf32> -> vector<8x16xf32>
    %cst_27 = arith.constant dense<0xFF800000> : vector<8xf32>
    %71 = vector.multi_reduction <maximumf>, %70, %cst_27 [1] : vector<8x16xf32> to vector<8xf32>
    %72 = vector.shape_cast %71 : vector<8xf32> to vector<8x1xf32>
    %73 = vector.broadcast %72 : vector<8x1xf32> to vector<8x16xf32>
    %74 = arith.subf %70, %73 : vector<8x16xf32>
    %75 = math.exp %74 : vector<8x16xf32>
    %cst_28 = arith.constant dense<0.000000e+00> : vector<8xf32>
    %76 = vector.multi_reduction <add>, %75, %cst_28 [1] : vector<8x16xf32> to vector<8xf32>
    %77 = vector.shape_cast %76 : vector<8xf32> to vector<8x1xf32>
    %78 = tpu.reciprocal %77 {approx = true} : vector<8x1xf32> -> vector<8x1xf32>
    %79 = vector.broadcast %78 : vector<8x1xf32> to vector<8x16xf32>
    %80 = arith.mulf %75, %79 : vector<8x16xf32>
    %81 = arith.truncf %80 : vector<8x16xf32> to vector<8x16xbf16>
    %cst_29 = arith.constant dense<0.000000e+00> : vector<8x32xf32>
    %82 = tpu.matmul %81, %69, %cst_29 {dimension_numbers = #tpu.dot_dimension_numbers<[1], [0], [0], [1], [0, 0, 1, 1], [], []>} : vector<8x16xbf16>, vector<16x32xbf16>, vector<8x32xf32> -> vector<8x32xf32>
    %83 = tpu.concatenate %34, %50, %66, %82 in 1 : vector<8x32xf32>, vector<8x32xf32>, vector<8x32xf32>, vector<8x32xf32> -> vector<8x128xf32>
    %84 = arith.truncf %83 : vector<8x128xf32> to vector<8x128xbf16>
    %c0_30 = arith.constant 0 : index
    %c0_31 = arith.constant 0 : index
    %85 = vector.load %arg8[%c0_30, %c0_31] : memref<128x128xbf16, #tpu.memory_space<vmem>>, vector<128x128xbf16>
    %cst_32 = arith.constant dense<0.000000e+00> : vector<8x128xf32>
    %86 = tpu.matmul %84, %85, %cst_32 {dimension_numbers = #tpu.dot_dimension_numbers<[1], [0], [0], [1], [0, 0, 1, 1], [], []>} : vector<8x128xbf16>, vector<128x128xbf16>, vector<8x128xf32> -> vector<8x128xf32>
    %c0_33 = arith.constant 0 : index
    %c0_34 = arith.constant 0 : index
    %87 = vector.load %arg9[%c0_33, %c0_34] : memref<1x128xf32, #tpu.memory_space<vmem>>, vector<1x128xf32>
    %88 = vector.broadcast %87 : vector<1x128xf32> to vector<8x128xf32>
    %89 = arith.addf %86, %88 : vector<8x128xf32>
    %c0_35 = arith.constant 0 : index
    %c0_36 = arith.constant 0 : index
    %c0_37 = arith.constant 0 : index
    %90 = vector.load %arg10[%c0_35, %c0_36, %c0_37] : memref<1x8x128xf32, #tpu.memory_space<vmem>>, vector<1x8x128xf32>
    %91 = vector.shape_cast %90 : vector<1x8x128xf32> to vector<8x128xf32>
    %92 = vector.shape_cast %89 : vector<8x128xf32> to vector<1x8x128xf32>
    tpu.vector_store %arg10[%c0_35, %c0_36, %c0_37], %92 {strides = array<i32>} : memref<1x8x128xf32, #tpu.memory_space<vmem>>, vector<1x8x128xf32>,
    return
  }
  func.func @transform_0(%arg0: i32, %arg1: i32) -> (i32, i32, i32) {
    %c0_i32 = arith.constant 0 : i32
    %c0_i32_0 = arith.constant 0 : i32
    return %arg0, %arg1, %c0_i32 : i32, i32, i32
  }
  func.func @transform_1(%arg0: i32, %arg1: i32) -> (i32, i32, i32) {
    %c0_i32 = arith.constant 0 : i32
    %c0_i32_0 = arith.constant 0 : i32
    %c0_i32_1 = arith.constant 0 : i32
    return %arg0, %c0_i32, %c0_i32_0 : i32, i32, i32
  }
  func.func @transform_2(%arg0: i32, %arg1: i32) -> (i32, i32) {
    %c0_i32 = arith.constant 0 : i32
    %c0_i32_0 = arith.constant 0 : i32
    %c0_i32_1 = arith.constant 0 : i32
    return %c0_i32, %c0_i32_0 : i32, i32
  }
  func.func @transform_3(%arg0: i32, %arg1: i32) -> (i32, i32) {
    %c0_i32 = arith.constant 0 : i32
    %c0_i32_0 = arith.constant 0 : i32
    %c0_i32_1 = arith.constant 0 : i32
    return %c0_i32, %c0_i32_0 : i32, i32
  }
  func.func @transform_4(%arg0: i32, %arg1: i32) -> (i32, i32) {
    %c0_i32 = arith.constant 0 : i32
    %c0_i32_0 = arith.constant 0 : i32
    %c0_i32_1 = arith.constant 0 : i32
    return %c0_i32, %c0_i32_0 : i32, i32
  }
  func.func @transform_5(%arg0: i32, %arg1: i32) -> (i32, i32) {
    %c0_i32 = arith.constant 0 : i32
    %c0_i32_0 = arith.constant 0 : i32
    %c0_i32_1 = arith.constant 0 : i32
    return %c0_i32, %c0_i32_0 : i32, i32
  }
  func.func @transform_6(%arg0: i32, %arg1: i32) -> (i32, i32) {
    %c0_i32 = arith.constant 0 : i32
    %c0_i32_0 = arith.constant 0 : i32
    %c0_i32_1 = arith.constant 0 : i32
    return %c0_i32, %c0_i32_0 : i32, i32
  }
  func.func @transform_7(%arg0: i32, %arg1: i32) -> (i32, i32) {
    %c0_i32 = arith.constant 0 : i32
    %c0_i32_0 = arith.constant 0 : i32
    %c0_i32_1 = arith.constant 0 : i32
    return %c0_i32, %c0_i32_0 : i32, i32
  }
  func.func @transform_8(%arg0: i32, %arg1: i32) -> (i32, i32, i32) {
    %c0_i32 = arith.constant 0 : i32
    %c0_i32_0 = arith.constant 0 : i32
    return %arg0, %arg1, %c0_i32 : i32, i32, i32
  }
}

</mosaic_0001>

<bundles_post_ra>
// kernel: cross_attention_forward.1
= control target key start
LH: loop header
LB: loop body
LE: loop exit
PB: predicated region body
PF: predicated region fallthrough
CT: control target
= control target key end

     0   :  { %13 = vsyncpa [#allocation3], 0  ;;  %s1603_s0 = inlined_call_operand.vmem [shape: bf16[2,8,128], index: 0, kind: input, shape index: {}]   ;;  %s1604_s1 = inlined_call_operand.vmem [shape: bf16[2,16,128], index: 1, kind: input, shape index: {}]   ;;  %s1605_s2 = inlined_call_operand.vmem [shape: bf16[128,128], index: 2, kind: input, shape index: {}]   ;;  %s1606_s3 = inlined_call_operand.vmem [shape: f32[1,128], index: 3, kind: input, shape index: {}]   ;;  %s1607_s4 = inlined_call_operand.hbm [shape: bf16[128,256], index: 4, kind: input, shape index: {}]   ;;  %s1608_s5 = inlined_call_operand.vmem [shape: f32[1,256], index: 5, kind: input, shape index: {}]   ;;  %s1609_s6 = inlined_call_operand.hbm [shape: bf16[128,128], index: 6, kind: input, shape index: {}]   ;;  %s1610_s7 = inlined_call_operand.vmem [shape: f32[1,128], index: 7, kind: input, shape index: {}]   ;;  %s1611_s8 = inlined_call_operand.vmem [shape: f32[2,8,128], index: 8, kind: output, shape index: {}]  }
   0x1   :  { %14 = vsyncpa [#allocation5], 0  ;;  %s1451_s27 = smov 0   ;;  %s1453_s28 = smov 0  }
   0x2   :  { %s1455_s29 = smov 0  }
   0x3 LB: > { %s1046_s30 = sadd.s32 4294967295, %s1395_s29   ;;  %s32_s9 = sadd.s32 1, %s1391_s28  ;;  %s1395_s29 = sphi %s1455_s29, %s20_s29   ;;  %s1391_s28 = sphi %s1453_s28, %s1615_s28   ;;  %s1387_s27 = sphi %s1451_s27, %s1614_s27  }
   0x4   : > { %p34_p0 = scmp.ge.s32.totalorder %s32_s9, 2  ;;  %p1048_p1 = scmp.ge.s32.totalorder %s1395_s29, 1 }
   0x5   : > { %p245_p2 = scmp.lt.s32.totalorder %s1395_s29, 3  ;;  %p1476_p4 = scmp.eq.s32.totalorder %s1046_s30, 0 }
   0x6   : > { %s1617_s9 = smov (%p34_p0, %s32_s9), 0  ;;  %s262_s14 = sshll.u32 %s1607_s4, 4  ;;  %s263_s14 = int_to_ptr.hbm [resolvable:$true] %s262_s14 }
   0x7   : > { %p1472_p3 = pnand %p1048_p1, %p245_p2  ;;  %s1397_s15 = smov [#allocation2]  }
   0x8   : > { %s264_s16 = sshll.u32 %s1397_s15, 4  ;;  %s279_s19 = sshll.u32 %s1609_s6, 4  ;;  %s265_s16 = int_to_ptr.vmem [resolvable:$true] %s264_s16  ;;  %s280_s19 = int_to_ptr.hbm [resolvable:$true] %s279_s19 }
   0x9   : > { %p1243_p5 = pneg %p1472_p3  ;;  %s1398_s20 = smov 128  }
   0xa   : > { %s1399_s21 = smov 8   ;;  %s1400_s22 = smov [#allocation4]  }
   0xb   : > { %p1244_p6 = pnand %p1476_p4, %p1243_p5  ;;  %s281_s23 = sshll.u32 %s1400_s22, 4  ;;  %s282_s23 = int_to_ptr.vmem [resolvable:$true] %s281_s23 }
   0xc   : > { %s1401_s24 = smov 64   ;;  %s1402_s25 = smov 4  }
   0xd   : > { %1246 = dma.hbm_to_vmem [thread:$0]  (!%p1244_p6), %s263_s14, 2048, %s265_s16, [#allocation3], %s1398_s20, %s1398_s20, %s1399_s21  }
   0xe   : > { %1249 = dma.hbm_to_vmem [thread:$0]  (!%p1244_p6), %s280_s19, 1024, %s282_s23, [#allocation5], %s1401_s24, %s1401_s24, %s1402_s25  }
   0xf   : > { %318 = sbr.rel (%p1472_p3) target bundleno = 1410 (0x582), region = 52 }
  0x14   : > { %1378 = dma.done.wait (%p1476_p4), [#allocation3], 2048  }
  0x15   : > { %1380 = vsyncadd (%p1476_p4), [#allocation3], 4294965248 }
  0x16   : > { %1382 = dma.done.wait (%p1476_p4), [#allocation5], 1024  }
  0x17   : > { %1384 = vsyncadd (%p1476_p4), [#allocation5], 4294966272  ;;  %v1153_v0 = vld [vmem:[#allocation2 + $0x70] sm:$0xf]  ;;  %v1226_v1 = vld [vmem:[#allocation2 + $0x74] sm:$0xf0] }
  0x18   : > { %v1145_v2 = vld [vmem:[#allocation2 + $0x60] sm:$0xf]  ;;  %v1154_v3 = vor.u32 %v1226_v1, %v1153_v0  ;;  %v1224_v4 = vld [vmem:[#allocation2 + $0x64] sm:$0xf0]  ;;  %v1210_v5 = vld [vmem:[%s1605_s2 + $0x38] sm:$0xff]  ;;  %p367_p7 = scmp.lt.s32.totalorder %s1387_s27, 1 }
  0x19   : > { %v1146_v6 = vor.u32 %v1224_v4, %v1145_v2  ;;  %v1137_v7 = vld [vmem:[#allocation2 + $0x50] sm:$0xf]  ;;  %v1222_v8 = vld [vmem:[#allocation2 + $0x54] sm:$0xf0]  ;;  %458 = vmatpush.bf16.msra.mxu0 %v1210_v5  ;;  %v1129_v11 = vld [vmem:[#allocation2 + $0x40] sm:$0xf] }
  0x1a   : > { %579 = vmatpush.bf16.msra.mxu1 %v1154_v3  ;;  %v1209_v9 = vld [vmem:[%s1605_s2 + $0x30] sm:$0xff]  ;;  %v1138_v10 = vor.u32 %v1222_v8, %v1137_v7  ;;  %v1220_v12 = vld [vmem:[#allocation2 + $0x44] sm:$0xf0]  ;;  %v1155_v15 = vld [vmem:[#allocation2 + $0x78] sm:$0xf0]  ;;  %s1619_s27 = smov (!%p367_p7, %s1387_s27), 1 }
  0x1b   : > { %v1208_v13 = vld [vmem:[%s1605_s2 + $0x28] sm:$0xff]  ;;  %v1225_v14 = vld [vmem:[#allocation2 + $0x74] sm:$0xf]  ;;  %v1223_v16 = vld [vmem:[#allocation2 + $0x64] sm:$0xf]  ;;  %v1130_v19 = vor.u32 %v1220_v12, %v1129_v11  ;;  %s1201_s20 = sshll.u32 %s1619_s27, 3 }
  0x1c   : > { %v1147_v17 = vld [vmem:[#allocation2 + $0x68] sm:$0xf0]  ;;  %v1158_v18 = vor.u32 %v1225_v14, %v1155_v15  ;;  %v1121_v20 = vld [vmem:[#allocation2 + $0x30] sm:$0xf]  ;;  %v1218_v21 = vld [vmem:[#allocation2 + $0x34] sm:$0xf0]  ;;  %s378_s26 = scalar_lea.vmem %s1604_s1, %s1201_s20 }
  0x1d   : > { %459 = vmatpush.bf16.msra.mxu0 %v1209_v9  ;;  %v1207_v22 = vld [vmem:[%s1605_s2 + $0x20] sm:$0xff]  ;;  %v1150_v23 = vor.u32 %v1223_v16, %v1147_v17  ;;  %v1221_v24 = vld [vmem:[#allocation2 + $0x54] sm:$0xf]  ;;  %v1139_v25 = vld [vmem:[#allocation2 + $0x58] sm:$0xf0]  ;;  %v1122_v26 = vor.u32 %v1218_v21, %v1121_v20  ;;  %s1055_s23 = sshll.u32 %s1619_s27, 2 }
  0x1e   : > { %580 = vmatpush.bf16.msra.mxu1 %v1146_v6  ;;  %593 = vmatpush.bf16.msra.mxu2 %v1158_v18  ;;  %v1113_v27 = vld [vmem:[#allocation2 + $0x20] sm:$0xf]  ;;  %v1216_v28 = vld [vmem:[#allocation2 + $0x24] sm:$0xf0]  ;;  %v1206_v29 = vld [vmem:[%s1605_s2 + $0x18] sm:$0xff]  ;;  %v1142_v30 = vor.u32 %v1221_v24, %v1139_v25  ;;  %s373_s13 = scalar_lea.vmem %s1603_s0, %s1055_s23  ;;  %vm617_vm0 = vcmask 261120  }
  0x1f   : > { %v1219_v31 = vld [vmem:[#allocation2 + $0x44] sm:$0xf]  ;;  %v1131_v32 = vld [vmem:[#allocation2 + $0x48] sm:$0xf0]  ;;  %v1114_v33 = vor.u32 %v1216_v28, %v1113_v27  ;;  %v1105_v34 = vld [vmem:[#allocation2 + $0x10] sm:$0xf] }
  0x20   : > { %v1214_v35 = vld [vmem:[#allocation2 + $0x14] sm:$0xf0]  ;;  %v1205_v36 = vld [vmem:[%s1605_s2 + $0x10] sm:$0xff]  ;;  %v1134_v37 = vor.u32 %v1219_v31, %v1131_v32  ;;  %v1123_v39 = vld [vmem:[#allocation2 + $0x38] sm:$0xf0]  ;;  %s1403_s18 = smov 64  }
  0x21   : > { %460 = vmatpush.bf16.msra.mxu0 %v1208_v13  ;;  %v1217_v38 = vld [vmem:[#allocation2 + $0x34] sm:$0xf]  ;;  %v1106_v40 = vor.u32 %v1214_v35, %v1105_v34  ;;  %v1097_v41 = vld [vmem:[#allocation2] sm:$0xf]  ;;  %v1212_v42 = vld [vmem:[#allocation2 + $0x4] sm:$0xf0] }
  0x22   : > { %581 = vmatpush.bf16.msra.mxu1 %v1138_v10  ;;  %594 = vmatpush.bf16.msra.mxu2 %v1150_v23  ;;  %v1204_v43 = vld [vmem:[%s1605_s2 + $0x8] sm:$0xff]  ;;  %v1126_v44 = vor.u32 %v1217_v38, %v1123_v39  ;;  %v1215_v45 = vld [vmem:[#allocation2 + $0x24] sm:$0xf]  ;;  %v1098_v47 = vor.u32 %v1212_v42, %v1097_v41  ;;  %v1213_v50 = vld [vmem:[#allocation2 + $0x14] sm:$0xf]  ;;  %s1404_s19 = smov 96  }
  0x23   : > { %v1115_v46 = vld [vmem:[#allocation2 + $0x28] sm:$0xf0]  ;;  %v1203_v48 = vld [vmem:[%s1605_s2] sm:$0xff]  ;;  %v1107_v51 = vld [vmem:[#allocation2 + $0x18] sm:$0xf0]  ;;  %s1405_s21 = smov 32  }
  0x24   : > { %v1118_v49 = vor.u32 %v1215_v45, %v1115_v46  ;;  %v1202_v52 = vld [vmem:[%s378_s26] sm:$0xff]  ;;  %v1110_v54 = vor.u32 %v1213_v50, %v1107_v51  ;;  %v1099_v56 = vld [vmem:[#allocation2 + $0x8] sm:$0xf0]  ;;  %vm637_vm1 = vcmask 130048   ;;  %vm850_vm2 = vcmask 523264   ;;  %s385_s26 = scalar_lea.vmem %s1611_s8, %s1201_s20 }
  0x25   : > { %461 = vmatpush.bf16.msra.mxu0 %v1207_v22  ;;  %v387_v53 = vld [vmem:[%s373_s13] sm:$0xf]  ;;  %v1211_v55 = vld [vmem:[#allocation2 + $0x4] sm:$0xf]  ;;  %vm852_vm3 = vcmask 785408  }
  0x26   : > { %582 = vmatpush.bf16.msra.mxu1 %v1130_v19  ;;  %595 = vmatpush.bf16.msra.mxu2 %v1142_v30  ;;  %v1102_v57 = vor.u32 %v1211_v55, %v1099_v56  ;;  %v487_v58 = vld [vmem:[%s1608_s5] sm:$0x3] }
  0x27   : > { %v489_v60 = vperm.slane %v487_v58, 0  ;;  %v1287_v63 = vld [vmem:[%s1606_s3] ss:$0 sm:$0xff]  ;;  %v490_v13 = vperm.slane %v487_v58, 1 }
  0x29   : > { %462 = vmatpush.bf16.msra.mxu0 %v1206_v29 }
  0x2a   : > { %583 = vmatpush.bf16.msra.mxu1 %v1122_v26  ;;  %596 = vmatpush.bf16.msra.mxu2 %v1134_v37 }
  0x2d   : > { %463 = vmatpush.bf16.msra.mxu0 %v1205_v36 }
  0x2e   : > { %584 = vmatpush.bf16.msra.mxu1 %v1114_v33  ;;  %597 = vmatpush.bf16.msra.mxu2 %v1126_v44 }
  0x31   : > { %464 = vmatpush.bf16.msra.mxu0 %v1204_v43 }
  0x32   : > { %585 = vmatpush.bf16.msra.mxu1 %v1106_v40  ;;  %598 = vmatpush.bf16.msra.mxu2 %v1118_v49 }
  0x35   : > { %465 = vmatpush.bf16.msra.mxu0 %v1203_v48 }
  0x36   : > { %586 = vmatpush.bf16.msra.mxu1 %v1098_v47  ;;  %599 = vmatpush.bf16.msra.mxu2 %v1110_v54 }
  0x38   : > { %466 = vmatmul.bf16.vlgmr.msra.gmra.mxu0 %v387_v53 }
  0x39   : > { %587 = vmatmul.bf16.vlgmr.msra.gmra.mxu1 %v1202_v52 }
  0x3a   : > { %600 = vmatpush.bf16.msra.mxu2 %v1102_v57 }
  0x3d   : > { %601 = vmatmul.bf16.vlgmr.msra.gmra.mxu2 %v1202_v52 }
  0xb5   : > { %v467_v61 = vpop.f32.mrf.mxu0 }
  0xb6   : > { %v588_v59 = vpop.f32.mrf.mxu1  ;;  %v468_v3 = vadd.f32 %v1287_v63, %v467_v61 }
  0xb7   : > { %v589_v62 = vadd.f32 %v588_v59, %v489_v60 }
  0xb8   : > { %v607_v8 = vpack.c.bf16 %v468_v3, %v468_v3 }
  0xb9   : > { %v608_v1 = vpack.c.bf16 %v589_v62, %v589_v62 }
  0xba   : > { %v673_v10 = vunpack.c.l.b16 %v607_v8 }
  0xbb   : > { %v614_v6 = vunpack.c.l.b16 %v608_v1 }
  0xbc   : > { %v674_v12 = vpack.c.b16 %v673_v10, %v673_v10 }
  0xbd   : > { %v469_v4 = vpop.f32.mrf.mxu0 }
  0xbe   : > { %v590_v0 = vpop.f32.mrf.mxu1 }
  0xbf   : > { %v591_v2 = vadd.f32 %v590_v0, %v489_v60 }
  0xc0   : > { %v602_v14 = vpop.f32.mrf.mxu2 }
  0xc1   : > { %v609_v5 = vpack.c.bf16 %v591_v2, %v591_v2  ;;  %v603_v15 = vadd.f32 %v602_v14, %v490_v13 }
  0xc3   : > { %v615_v7 = vunpack.c.l.b16 %v609_v5  ;;  %v610_v16 = vpack.c.bf16 %v603_v15, %v603_v15 }
  0xc5   : > { %v616_v9 = vpack.c.b16 %v615_v7, %v614_v6  ;;  %v652_v19 = vunpack.c.l.b16 %v610_v16 }
  0xc7   : > { %731 = vrot.lane.b32.xlu2 %v616_v9, %s1403_s18  ;;  %677 = vrot.lane.b32.xlu1 %v616_v9, %s1404_s19  ;;  %v622_v11 = vsel %vm617_vm0, %v616_v9, 0 }
  0xc8   : > { %631 = vmatpush.bf16.xpose.msra.mxu3 %v622_v11  ;;  %v604_v17 = vpop.f32.mrf.mxu2 }
  0xc9   : > { %v605_v18 = vadd.f32 %v604_v17, %v490_v13 }
  0xcb   : > { %v611_v20 = vpack.c.bf16 %v605_v18, %v605_v18 }
  0xcd   : > { %v653_v21 = vunpack.c.l.b16 %v611_v20 }
  0xcf   : > { %785 = vrot.lane.b32.xlu2 %v616_v9, %s1405_s21  ;;  %675 = vrot.lane.b32.xlu1 %v674_v12, %s1404_s19  ;;  %v1551_v22 = vpack.c.b16 %v653_v21, %v652_v19 }
  0xd0   : > { %1159 = vmatmul.msk.bf16.vlgmr.msra.gmra.mxu3 %vm617_vm0, %v607_v8 }
  0xd1   : > { %666 = vmatpush.bf16.msrb.mxu3 %v1551_v22 }
  0xd7   : > { %783 = vrot.lane.b32.xlu1 %v674_v12, %s1405_s21 }
 0x121   : > { %v732_v23 = vpop.permute.xlu2 %731 }
 0x122   : > { %v737_v24 = vsel %vm617_vm0, %v732_v23, 0 }
 0x123   : > { %746 = vmatpush.bf16.xpose.msrb.mxu2 %v737_v24 }
 0x129   : > { %v786_v38 = vpop.permute.xlu2 %785 }
 0x12a   : > { %v791_v40 = vsel %vm617_vm0, %v786_v38, 0 }
 0x139   : > { %v678_v25 = vpop.permute.xlu1 %677 }
 0x13a   : > { %v683_v26 = vsel %vm617_vm0, %v678_v25, 0 }
 0x13b   : > { %692 = vmatpush.bf16.xpose.msra.mxu3 %v683_v26 }
 0x141   : > { %v676_v42 = vpop.permute.xlu1 %675 }
 0x149   : > { %v784_v43 = vpop.permute.xlu1 %783 }
 0x153   : > { %v633_v27 = vpop.f32.mrf.mxu3 }
 0x154   : > { %v638_v28 = vsel %vm637_vm1, %v633_v27, -inf }
 0x155   : > { %639 = vmax.xlane.f32.xlu0 %v638_v28  ;;  %v1233_v28 = vld [vmem:[#allocation4 + $0x30] sm:$0xff] }
 0x15b   : > { %v635_v29 = vpop.f32.mrf.mxu3 }
 0x15c   : > { %v1232_v29 = vld [vmem:[#allocation4 + $0x28] sm:$0xff] }
 0x1c8   : > { %v640_v30 = vpop.xlane.xlu0 %639 }
 0x1c9   : > { %v641_v31 = vsub.f32 %v633_v27, %v640_v30  ;;  %v1234_v27 = vld [vmem:[#allocation4 + $0x38] sm:$0xff]  ;;  %v1231_v30 = vld [vmem:[#allocation4 + $0x20] sm:$0xff] }
 0x1ca   : > { %923 = vmatpush.bf16.msrb.mxu1 %v1234_v27 }
 0x1cb   : > { %v642_v32 = vmul.f32 1.442695, %v641_v31  ;;  %v1230_v31 = vld [vmem:[#allocation4 + $0x18] sm:$0xff] }
 0x1cd   : > { %1289 = vpow2.f32 %v642_v32  ;;  %v1229_v32 = vld [vmem:[#allocation4 + $0x10] sm:$0xff] }
 0x1ce   : > { %924 = vmatpush.bf16.msrb.mxu1 %v1233_v28 }
 0x1d2   : > { %925 = vmatpush.bf16.msrb.mxu1 %v1232_v29 }
 0x1d3   : > { %v1290_v33 = vpop.eup %1289 }
 0x1d4   : > { %v644_v34 = vsel %vm637_vm1, %v1290_v33, 0.0 }
 0x1d5   : > { %645 = vadd.xlane.f32.xlu0 %v644_v34  ;;  %v1227_v34 = vld [vmem:[#allocation4] sm:$0xff] }
 0x1d6   : > { %926 = vmatpush.bf16.msrb.mxu1 %v1231_v30 }
 0x1da   : > { %927 = vmatpush.bf16.msrb.mxu1 %v1230_v31 }
 0x1de   : > { %928 = vmatpush.bf16.msrb.mxu1 %v1229_v32 }
 0x1e9   : > { %729 = vrot.lane.b32.xlu0 %v674_v12, %s1403_s18 }
 0x248   : > { %v646_v35 = vpop.xlane.xlu0 %645 }
 0x249   : > { %1291 = vrcp.f32 %v646_v35 }
 0x24f   : > { %v1292_v36 = vpop.eup %1291 }
 0x250   : > { %v648_v37 = vmul.f32 %v1292_v36, %v1290_v33  ;;  %v1228_v33 = vld [vmem:[#allocation4 + $0x8] sm:$0xff] }
 0x251   : > { %929 = vmatpush.bf16.msrb.mxu1 %v1228_v33 }
 0x252   : > { %v649_v39 = vpack.c.bf16 %v648_v37, %v648_v37 }
 0x254   : > { %1160 = vmatmul.msk.bf16.vlgmr.msrb.gmra.mxu3 %vm637_vm1, %v649_v39 }
 0x255   : > { %800 = vmatpush.bf16.xpose.msrb.mxu3 %v791_v40  ;;  %930 = vmatpush.bf16.msrb.mxu1 %v1227_v34 }
 0x25b   : > { %v730_v41 = vpop.permute.xlu0 %729 }
 0x25c   : > { %1163 = vmatmul.msk.bf16.vlgmr.msrb.gmra.mxu2 %vm617_vm0, %v730_v41 }
 0x264   : > { %1161 = vmatmul.msk.bf16.vlgmr.msra.gmra.mxu3 %vm617_vm0, %v676_v42  ;;  %v1288_v42 = vld [vmem:[%s1610_s7] ss:$0 sm:$0xff] }
 0x274   : > { %1165 = vmatmul.msk.bf16.vlgmr.msrb.gmra.mxu3 %vm617_vm0, %v784_v43 }
 0x2d7   : > { %v1564_v44 = vpop.f32.mrf.mxu3 }
 0x2df   : > { %v670_v45 = vpop.f32.mrf.mxu3  ;;  %v748_v46 = vpop.f32.mrf.mxu2 }
 0x2e0   : > { %v752_v47 = vsel %vm637_vm1, %v748_v46, -inf }
 0x2e1   : > { %753 = vmax.xlane.f32.xlu1 %v752_v47 }
 0x2e7   : > { %v694_v48 = vpop.f32.mrf.mxu3  ;;  %v750_v49 = vpop.f32.mrf.mxu2 }
 0x2e8   : > { %v698_v50 = vsel %vm637_vm1, %v694_v48, -inf }
 0x2e9   : > { %699 = vmax.xlane.f32.xlu2 %v698_v50 }
 0x2ef   : > { %v696_v51 = vpop.f32.mrf.mxu3 }
 0x2f7   : > { %v802_v52 = vpop.f32.mrf.mxu3 }
 0x2f8   : > { %v806_v53 = vsel %vm637_vm1, %v802_v52, -inf }
 0x2f9   : > { %807 = vmax.xlane.f32.xlu0 %v806_v53 }
 0x2ff   : > { %v804_v54 = vpop.f32.mrf.mxu3 }
 0x30d   : > { %764 = vrot.lane.b32.xlu0 %v1551_v22, %s1403_s18 }
 0x354   : > { %v754_v55 = vpop.xlane.xlu1 %753 }
 0x355   : > { %v755_v56 = vsub.f32 %v748_v46, %v754_v55 }
 0x357   : > { %v756_v57 = vmul.f32 1.442695, %v755_v56 }
 0x359   : > { %1293 = vpow2.f32 %v756_v57 }
 0x35c   : > { %v700_v58 = vpop.xlane.xlu2 %699 }
 0x35d   : > { %v701_v59 = vsub.f32 %v694_v48, %v700_v58 }
 0x35f   : > { %v1294_v60 = vpop.eup %1293  ;;  %v702_v61 = vmul.f32 1.442695, %v701_v59 }
 0x360   : > { %v758_v62 = vsel %vm637_vm1, %v1294_v60, 0.0 }
 0x361   : > { %1295 = vpow2.f32 %v702_v61  ;;  %759 = vadd.xlane.f32.xlu1 %v758_v62 }
 0x367   : > { %v1296_v63 = vpop.eup %1295 }
 0x368   : > { %v704_v0 = vsel %vm637_vm1, %v1296_v63, 0.0 }
 0x369   : > { %705 = vadd.xlane.f32.xlu2 %v704_v0 }
 0x36c   : > { %v808_v1 = vpop.xlane.xlu0 %807 }
 0x36d   : > { %v809_v2 = vsub.f32 %v802_v52, %v808_v1 }
 0x36f   : > { %v810_v3 = vmul.f32 1.442695, %v809_v2 }
 0x371   : > { %1297 = vpow2.f32 %v810_v3 }
 0x377   : > { %v1298_v4 = vpop.eup %1297 }
 0x378   : > { %v812_v5 = vsel %vm637_vm1, %v1298_v4, 0.0 }
 0x379   : > { %813 = vadd.xlane.f32.xlu1 %v812_v5 }
 0x37f   : > { %v765_v6 = vpop.permute.xlu0 %764 }
 0x380   : > { %777 = vmatpush.bf16.msra.mxu2 %v765_v6 }
 0x381   : > { %710 = vrot.lane.b32.xlu2 %v1551_v22, %s1404_s19 }
 0x392   : > { %818 = vrot.lane.b32.xlu1 %v1551_v22, %s1405_s21 }
 0x3d4   : > { %v760_v7 = vpop.xlane.xlu1 %759 }
 0x3d5   : > { %1299 = vrcp.f32 %v760_v7 }
 0x3db   : > { %v1300_v8 = vpop.eup %1299 }
 0x3dc   : > { %v762_v9 = vmul.f32 %v1300_v8, %v1294_v60  ;;  %v706_v10 = vpop.xlane.xlu2 %705 }
 0x3dd   : > { %1301 = vrcp.f32 %v706_v10 }
 0x3de   : > { %v763_v11 = vpack.c.bf16 %v762_v9, %v762_v9 }
 0x3e0   : > { %1164 = vmatmul.msk.bf16.vlgmr.msra.gmra.mxu2 %vm637_vm1, %v763_v11 }
 0x3e3   : > { %v1302_v12 = vpop.eup %1301 }
 0x3e4   : > { %v708_v13 = vmul.f32 %v1302_v12, %v1296_v63  ;;  %v711_v14 = vpop.permute.xlu2 %710 }
 0x3e5   : > { %723 = vmatpush.bf16.msrb.mxu0 %v711_v14 }
 0x3e6   : > { %v709_v15 = vpack.c.bf16 %v708_v13, %v708_v13 }
 0x3e8   : > { %1162 = vmatmul.msk.bf16.vlgmr.msrb.gmra.mxu0 %vm637_vm1, %v709_v15 }
 0x3ec   : > { %v814_v16 = vpop.xlane.xlu1 %813 }
 0x3ed   : > { %1303 = vrcp.f32 %v814_v16 }
 0x3f3   : > { %v1304_v17 = vpop.eup %1303 }
 0x3f4   : > { %v816_v18 = vmul.f32 %v1304_v17, %v1298_v4 }
 0x3f6   : > { %v817_v20 = vpack.c.bf16 %v816_v18, %v816_v18 }
 0x404   : > { %v819_v19 = vpop.permute.xlu1 %818 }
 0x405   : > { %831 = vmatpush.bf16.msra.mxu0 %v819_v19 }
 0x408   : > { %1166 = vmatmul.msk.bf16.vlgmr.msra.gmra.mxu0 %vm637_vm1, %v817_v20 }
 0x463   : > { %v779_v21 = vpop.f32.mrf.mxu2 }
 0x465   : > { %v725_v22 = vpop.f32.mrf.mxu0 }
 0x466   : > { %838 = vrot.lane.b32.xlu2 %v725_v22, %s1405_s21 }
 0x46b   : > { %v781_v23 = vpop.f32.mrf.mxu2 }
 0x46d   : > { %v727_v24 = vpop.f32.mrf.mxu0 }
 0x46e   : > { %842 = vrot.lane.b32.xlu2 %v779_v21, %s1403_s18 }
 0x485   : > { %v833_v25 = vpop.f32.mrf.mxu0 }
 0x486   : > { %846 = vrot.lane.b32.xlu0 %v833_v25, %s1404_s19 }
 0x48d   : > { %v835_v26 = vpop.f32.mrf.mxu0 }
 0x4c0   : > { %v839_v35 = vpop.permute.xlu2 %838 }
 0x4c1   : > { %v849_v37 = vsel %vm617_vm0, %v1564_v44, %v839_v35 }
 0x4c8   : > { %v843_v36 = vpop.permute.xlu2 %842 }
 0x4c9   : > { %v851_v38 = vsel %vm850_vm2, %v849_v37, %v843_v36 }
 0x4f8   : > { %v847_v39 = vpop.permute.xlu0 %846 }
 0x4f9   : > { %v853_v40 = vsel %vm852_vm3, %v851_v38, %v847_v39 }
 0x4fa   : > { %v854_v41 = vpack.c.bf16 %v853_v40, %v853_v40 }
 0x4fc   : > { %931 = vmatmul.bf16.vlgmr.msrb.gmra.mxu1 %v854_v41 }
 0x579   : > { %v932_v43 = vpop.f32.mrf.mxu1 }
 0x57a   : > { %v933_v45 = vadd.f32 %v1288_v42, %v932_v43 }
 0x57c   : > { %936 = vst [vmem:[%s385_s26] sm:$0xff] %v933_v45 }
 0x581   : > { %v934_v46 = vpop.f32.mrf.mxu1 }
 0x582 PF: > { %s20_s29 = sadd.s32 1, %s1395_s29   ;;  %s1614_s27 = smov %s1391_s28 }
 0x583   : > { %p17_p8 = scmp.ge.s32.totalorder %s20_s29, 4   ;;  %s1615_s28 = smov %s1617_s9 }
 0x585   :  { %19 = sbr.rel (!%p17_p8) target bundleno = 3 (0x3), region = 94 }
 0x58a   :  { %962 = vsyncpa [#allocation3], 1 }
 0x58b   :  { %964 = vsyncpa [#allocation3 + $0x1], 1 }
 0x58c   :  { %965 = vsyncpa [#allocation5], 1 }

</bundles_post_ra>
